<compile_context>
chip_gen: v6e
topology: v6e:2x2x1
jax: 0.10.0
libtpu: 0.0.40
codegen_flags: <defaults>
</compile_context>

<pallas_src>
import numpy as np
import jax
import jax.numpy as jnp
from jax.experimental import pallas as pl
from jax.experimental.pallas import tpu as pltpu


def _interp_matrix(in_size: int, out_size: int) -> np.ndarray:
    """Linear interpolation matrix (out_size, in_size), align_corners=True, float64."""
    out = np.arange(out_size, dtype=np.float64)
    if out_size > 1 and in_size > 1:
        src = out * (in_size - 1) / (out_size - 1)
    else:
        src = np.zeros_like(out)
    lo = np.clip(np.floor(src).astype(np.int64), 0, in_size - 1)
    hi = np.minimum(lo + 1, in_size - 1)
    frac = src - lo
    a = np.zeros((out_size, in_size), dtype=np.float64)
    np.add.at(a, (np.arange(out_size), lo), 1.0 - frac)
    np.add.at(a, (np.arange(out_size), hi), frac)
    return a


def up_trilinear_kernel(x_ref, k_ref, awb_ref, o_ref):
    # x_ref:   (1, D*H, B*W)     B packed channel-slices, row-major (D, H) rows
    # k_ref:   (Do*Ho, D*H)      kron(A_D, A_H)
    # awb_ref: (B*W, B*Wo)       kron(I_B, A_W^T)  (block diagonal)
    # o_ref:   (1, Do*Ho, B*Wo)  lane-dense output block
    t = jnp.dot(k_ref[...], x_ref[0], preferred_element_type=jnp.float32)  # (Do*Ho, B*W)
    y = jnp.dot(t, awb_ref[...], preferred_element_type=jnp.float32)       # (Do*Ho, B*Wo)
    o_ref[0] = y.astype(o_ref.dtype)


def _pick_pack_factor(nc: int, wo: int) -> int:
    """Smallest divisor B of nc with B*wo >= 128 (lane-dense stores); else nc."""
    for cand in range(1, nc + 1):
        if nc % cand == 0 and cand * wo >= 128:
            return cand
    return nc


def up_1(x: jax.Array) -> jax.Array:
    """2x trilinear upsample, align_corners=True. x: (N, C, D, H, W) float32."""
    N, C, D, H, W = x.shape
    Do, Ho, Wo = 2 * D, 2 * H, 2 * W
    NC = N * C

    B = _pick_pack_factor(NC, Wo)
    G = NC // B  # grid steps

    a_d = _interp_matrix(D, Do)
    a_h = _interp_matrix(H, Ho)
    a_w = _interp_matrix(W, Wo)
    # NOTE: for large D*H the dense kron would blow VMEM (v7x: 64 MiB); there
    # one would tile the Do*Ho axis with a second "arbitrary" grid dim or use
    # fully separable per-axis matmuls.  Tiny (16 KiB) at these sizes.
    k = jnp.asarray(np.kron(a_d, a_h).astype(np.float32))                         # (Do*Ho, D*H)
    awb = jnp.asarray(np.kron(np.eye(B, dtype=np.float64), a_w.T).astype(np.float32))  # (B*W, B*Wo)

    @jax.jit
    def run(xin, k_, awb_):
        # Single fused relayout: pack B channel-slices along the lane axis.
        xp = xin.reshape(G, B, D, H, W).transpose(0, 2, 3, 1, 4).reshape(G, D * H, B * W)

        out = pl.pallas_call(
            up_trilinear_kernel,
            out_shape=jax.ShapeDtypeStruct((G, Do * Ho, B * Wo), xin.dtype),
            grid=(G,),
            in_specs=[
                pl.BlockSpec((1, D * H, B * W), lambda g: (g, 0, 0)),
                # Constant index_maps -> pipeline fetches these weights only once.
                pl.BlockSpec((Do * Ho, D * H), lambda g: (0, 0)),
                pl.BlockSpec((B * W, B * Wo), lambda g: (0, 0)),
            ],
            out_specs=pl.BlockSpec((1, Do * Ho, B * Wo), lambda g: (g, 0, 0)),
            compiler_params=pltpu.CompilerParams(dimension_semantics=("parallel",)),
        )(xp, k_, awb_)

        # Undo the lane packing: (G, Do*Ho, B*Wo) -> (N, C, Do, Ho, Wo).
        y = out.reshape(G, Do, Ho, B, Wo).transpose(0, 3, 1, 2, 4)
        return y.reshape(N, C, Do, Ho, Wo)

    return run(x, k, awb)


def _ref_trilinear(x: np.ndarray) -> np.ndarray:
    """Independent NumPy reference: trilinear, scale 2, align_corners=True."""
    x = np.asarray(x, dtype=np.float64)
    N, C, D, H, W = x.shape
    Do, Ho, Wo = 2 * D, 2 * H, 2 * W
    out = np.zeros((N, C, Do, Ho, Wo), dtype=np.float64)

    def coords(o, S, So):
        s = o * (S - 1) / (So - 1) if (So > 1 and S > 1) else 0.0
        l = int(np.floor(s))
        return l, min(l + 1, S - 1), s - l

    for do in range(Do):
        d0, d1, fd = coords(do, D, Do)
        for ho in range(Ho):
            h0, h1, fh = coords(ho, H, Ho)
            for wo in range(Wo):
                w0, w1, fw = coords(wo, W, Wo)
                c00 = (1 - fw) * x[:, :, d0, h0, w0] + fw * x[:, :, d0, h0, w1]
                c01 = (1 - fw) * x[:, :, d0, h1, w0] + fw * x[:, :, d0, h1, w1]
                c10 = (1 - fw) * x[:, :, d1, h0, w0] + fw * x[:, :, d1, h0, w1]
                c11 = (1 - fw) * x[:, :, d1, h1, w0] + fw * x[:, :, d1, h1, w1]
                out[:, :, do, ho, wo] = (1 - fd) * ((1 - fh) * c00 + fh * c01) + fd * (
                    (1 - fh) * c10 + fh * c11
                )
    return out


if __name__ == "__main__":
    key = jax.random.PRNGKey(0)
    # (N, C, D, H, W) = (2, 4, 4, 8, 8) -> output (2, 4, 8, 16, 16)
    x = jax.random.normal(key, (2, 4, 4, 8, 8), dtype=jnp.float32)

    y = up_1(x)
    y = jax.block_until_ready(y)

    assert y.shape == (2, 4, 8, 16, 16), y.shape
    ref = _ref_trilinear(np.asarray(x))
    np.testing.assert_allclose(np.asarray(y), ref, rtol=1e-4, atol=1e-4)

    print("KERNEL_OK")
</pallas_src>

<mosaic_0001>
module attributes {stable_mosaic.version = 11 : i64} {
  func.func @up_trilinear_kernel(%arg0: i32, %arg1: memref<1x32x64xf32, #tpu.memory_space<vmem>>, %arg2: memref<128x32xf32, #tpu.memory_space<vmem>>, %arg3: memref<64x128xf32, #tpu.memory_space<vmem>>, %arg4: memref<1x128x128xf32, #tpu.memory_space<vmem>>) attributes {dimension_semantics = [#tpu.dimension_semantics<parallel>], iteration_bounds = array<i64: 1>, scalar_prefetch = 0 : i64, scratch_operands = 0 : i64, tpu.core_type = #tpu.core_type<tc>, window_params = [{transform_indices = @transform_0, window_bounds = array<i64: 1, 32, 64>}, {pipeline_mode = #tpu.pipeline_mode<synchronous>, transform_indices = @transform_1, window_bounds = array<i64: 128, 32>}, {pipeline_mode = #tpu.pipeline_mode<synchronous>, transform_indices = @transform_2, window_bounds = array<i64: 64, 128>}, {transform_indices = @transform_3, window_bounds = array<i64: 1, 128, 128>}]} {
    %c0 = arith.constant 0 : index
    %c0_0 = arith.constant 0 : index
    %0 = vector.load %arg2[%c0, %c0_0] : memref<128x32xf32, #tpu.memory_space<vmem>>, vector<128x32xf32>
    %c0_1 = arith.constant 0 : index
    %c0_2 = arith.constant 0 : index
    %c0_3 = arith.constant 0 : index
    %1 = vector.load %arg1[%c0_1, %c0_2, %c0_3] : memref<1x32x64xf32, #tpu.memory_space<vmem>>, vector<1x32x64xf32>
    %2 = vector.shape_cast %1 : vector<1x32x64xf32> to vector<32x64xf32>
    %cst = arith.constant dense<0.000000e+00> : vector<128x64xf32>
    %3 = tpu.matmul %0, %2, %cst {dimension_numbers = #tpu.dot_dimension_numbers<[1], [0], [0], [1], [0, 0, 1, 1], [], []>} : vector<128x32xf32>, vector<32x64xf32>, vector<128x64xf32> -> vector<128x64xf32>
    %c0_4 = arith.constant 0 : index
    %c0_5 = arith.constant 0 : index
    %4 = vector.load %arg3[%c0_4, %c0_5] : memref<64x128xf32, #tpu.memory_space<vmem>>, vector<64x128xf32>
    %cst_6 = arith.constant dense<0.000000e+00> : vector<128x128xf32>
    %5 = tpu.matmul %3, %4, %cst_6 {dimension_numbers = #tpu.dot_dimension_numbers<[1], [0], [0], [1], [0, 0, 1, 1], [], []>} : vector<128x64xf32>, vector<64x128xf32>, vector<128x128xf32> -> vector<128x128xf32>
    %c0_7 = arith.constant 0 : index
    %c0_8 = arith.constant 0 : index
    %c0_9 = arith.constant 0 : index
    %6 = vector.load %arg4[%c0_7, %c0_8, %c0_9] : memref<1x128x128xf32, #tpu.memory_space<vmem>>, vector<1x128x128xf32>
    %7 = vector.shape_cast %6 : vector<1x128x128xf32> to vector<128x128xf32>
    %8 = vector.shape_cast %5 : vector<128x128xf32> to vector<1x128x128xf32>
    tpu.vector_store %arg4[%c0_7, %c0_8, %c0_9], %8 {strides = array<i32>} : memref<1x128x128xf32, #tpu.memory_space<vmem>>, vector<1x128x128xf32>,
    return
  }
  func.func @transform_0(%arg0: i32) -> (i32, i32, i32) {
    %c0_i32 = arith.constant 0 : i32
    %c0_i32_0 = arith.constant 0 : i32
    %c0_i32_1 = arith.constant 0 : i32
    return %arg0, %c0_i32, %c0_i32_0 : i32, i32, i32
  }
  func.func @transform_1(%arg0: i32) -> (i32, i32) {
    %c0_i32 = arith.constant 0 : i32
    %c0_i32_0 = arith.constant 0 : i32
    %c0_i32_1 = arith.constant 0 : i32
    return %c0_i32, %c0_i32_0 : i32, i32
  }
  func.func @transform_2(%arg0: i32) -> (i32, i32) {
    %c0_i32 = arith.constant 0 : i32
    %c0_i32_0 = arith.constant 0 : i32
    %c0_i32_1 = arith.constant 0 : i32
    return %c0_i32, %c0_i32_0 : i32, i32
  }
  func.func @transform_3(%arg0: i32) -> (i32, i32, i32) {
    %c0_i32 = arith.constant 0 : i32
    %c0_i32_0 = arith.constant 0 : i32
    %c0_i32_1 = arith.constant 0 : i32
    return %arg0, %c0_i32, %c0_i32_0 : i32, i32, i32
  }
}

</mosaic_0001>

<bundles_post_ra>
// kernel: run.1
= control target key start
LH: loop header
LB: loop body
LE: loop exit
PB: predicated region body
PF: predicated region fallthrough
CT: control target
= control target key end

     0   :  { %vm34_vm0 = vcmask 261120   ;;  %vm236_vm1 = vcmask 523264   ;;  %s798_s0 = inlined_call_operand.vmem [shape: f32[1,32,64], index: 0, kind: input, shape index: {}]   ;;  %s799_s1 = inlined_call_operand.vmem [shape: f32[128,32], index: 1, kind: input, shape index: {}]   ;;  %s800_s2 = inlined_call_operand.vmem [shape: f32[64,128], index: 2, kind: input, shape index: {}]   ;;  %s801_s3 = inlined_call_operand.vmem [shape: f32[1,128,128], index: 3, kind: output, shape index: {}]  }
   0x1   :  { %v33_v0 = vld [vmem:[%s798_s0 + $0x18] sm:$0xff]  ;;  %v32_v1 = vld [vmem:[%s798_s0 + $0x10] sm:$0xff]  ;;  %v14_v2 = vld [vmem:[%s799_s1] sm:$0xff] }
   0x2   :  { %526 = vmatprep.subr.mxu0 %v33_v0  ;;  %v31_v3 = vld [vmem:[%s798_s0 + $0x8] sm:$0xff]  ;;  %534 = vmatprep.mubr.msk.f32.mxu0 %vm34_vm0, %v14_v2  ;;  %v30_v4 = vld [vmem:[%s798_s0] sm:$0xff]  ;;  %v235_v6 = vld [vmem:[%s800_s2 + $0x38] sm:$0xff] }
   0x3   :  { %527 = vmatpush3.msra.mxu0 %v33_v0  ;;  %v15_v5 = vld [vmem:[%s799_s1 + $0x8] sm:$0xff]  ;;  %v16_v7 = vld [vmem:[%s799_s1 + $0x10] sm:$0xff]  ;;  %598 = vmatprep.subr.mxu1 %v235_v6  ;;  %v17_v9 = vld [vmem:[%s799_s1 + $0x18] sm:$0xff] }
   0x4   :  { %528 = vmatprep.subr.mxu0 %v32_v1  ;;  %v234_v8 = vld [vmem:[%s800_s2 + $0x30] sm:$0xff]  ;;  %606 = vmatpush3.msra.mxu1 %v235_v6  ;;  %v233_v10 = vld [vmem:[%s800_s2 + $0x28] sm:$0xff]  ;;  %v18_v11 = vld [vmem:[%s799_s1 + $0x20] sm:$0xff] }
   0x5   :  { %529 = vmatpush3.msra.mxu0 %v32_v1  ;;  %599 = vmatprep.subr.mxu1 %v234_v8  ;;  %v232_v12 = vld [vmem:[%s800_s2 + $0x20] sm:$0xff]  ;;  %v19_v13 = vld [vmem:[%s799_s1 + $0x28] sm:$0xff]  ;;  %v231_v14 = vld [vmem:[%s800_s2 + $0x18] sm:$0xff] }
   0x6   :  { %530 = vmatprep.subr.mxu0 %v31_v3  ;;  %607 = vmatpush3.msra.mxu1 %v234_v8  ;;  %v20_v15 = vld [vmem:[%s799_s1 + $0x30] sm:$0xff]  ;;  %v21_v17 = vld [vmem:[%s799_s1 + $0x38] sm:$0xff]  ;;  %v22_v18 = vld [vmem:[%s799_s1 + $0x40] sm:$0xff] }
   0x7   :  { %531 = vmatpush3.msra.mxu0 %v31_v3  ;;  %600 = vmatprep.subr.mxu1 %v233_v10  ;;  %v230_v16 = vld [vmem:[%s800_s2 + $0x10] sm:$0xff]  ;;  %v23_v19 = vld [vmem:[%s799_s1 + $0x48] sm:$0xff]  ;;  %v25_v21 = vld [vmem:[%s799_s1 + $0x58] sm:$0xff] }
   0x8   :  { %532 = vmatprep.subr.mxu0 %v30_v4  ;;  %608 = vmatpush3.msra.mxu1 %v233_v10  ;;  %v24_v20 = vld [vmem:[%s799_s1 + $0x50] sm:$0xff]  ;;  %v26_v22 = vld [vmem:[%s799_s1 + $0x60] sm:$0xff]  ;;  %v27_v23 = vld [vmem:[%s799_s1 + $0x68] sm:$0xff] }
   0x9   :  { %533 = vmatpush3.msra.mxu0 %v30_v4  ;;  %601 = vmatprep.subr.mxu1 %v232_v12  ;;  %v28_v24 = vld [vmem:[%s799_s1 + $0x70] sm:$0xff]  ;;  %v29_v25 = vld [vmem:[%s799_s1 + $0x78] sm:$0xff]  ;;  %v229_v26 = vld [vmem:[%s800_s2 + $0x8] sm:$0xff] }
   0xa   :  { %535 = vmatmul.mubr.msk.f32.vlgmr.msra.gmra.mxu0 %vm34_vm0, %v15_v5  ;;  %558 = vmatprep.subr.mxu0 %v235_v6  ;;  %v228_v27 = vld [vmem:[%s800_s2] sm:$0xff] }
   0xb   :  { %537 = vmatprep.mubr.msk.f32.mxu0 %vm34_vm0, %v16_v7  ;;  %559 = vmatpush3.msra.mxu0 %v235_v6 }
   0xc   :  { %560 = vmatprep.subr.mxu0 %v234_v8  ;;  %609 = vmatpush3.msra.mxu1 %v232_v12 }
   0xd   :  { %561 = vmatpush3.msra.mxu0 %v234_v8  ;;  %602 = vmatprep.subr.mxu1 %v231_v14 }
   0xe   :  { %538 = vmatmul.mubr.msk.f32.gmra.mxu0 %vm34_vm0, %v17_v9  ;;  %562 = vmatprep.subr.mxu0 %v233_v10 }
   0xf   :  { %540 = vmatprep.mubr.msk.f32.mxu0 %vm34_vm0, %v18_v11  ;;  %563 = vmatpush3.msra.mxu0 %v233_v10 }
  0x10   :  { %564 = vmatprep.subr.mxu0 %v232_v12  ;;  %610 = vmatpush3.msra.mxu1 %v231_v14 }
  0x11   :  { %565 = vmatpush3.msra.mxu0 %v232_v12  ;;  %603 = vmatprep.subr.mxu1 %v230_v16 }
  0x12   :  { %541 = vmatmul.mubr.msk.f32.gmra.mxu0 %vm34_vm0, %v19_v13  ;;  %566 = vmatprep.subr.mxu0 %v231_v14 }
  0x13   :  { %543 = vmatprep.mubr.msk.f32.mxu0 %vm34_vm0, %v20_v15  ;;  %567 = vmatpush3.msra.mxu0 %v231_v14 }
  0x14   :  { %568 = vmatprep.subr.mxu0 %v230_v16  ;;  %611 = vmatpush3.msra.mxu1 %v230_v16 }
  0x15   :  { %569 = vmatpush3.msra.mxu0 %v230_v16  ;;  %604 = vmatprep.subr.mxu1 %v229_v26 }
  0x16   :  { %544 = vmatmul.mubr.msk.f32.gmra.mxu0 %vm34_vm0, %v21_v17  ;;  %570 = vmatprep.subr.mxu0 %v229_v26 }
  0x17   :  { %546 = vmatprep.mubr.msk.f32.mxu0 %vm34_vm0, %v22_v18  ;;  %571 = vmatpush3.msra.mxu0 %v229_v26 }
  0x18   :  { %612 = vmatpush3.msra.mxu1 %v229_v26  ;;  %572 = vmatprep.subr.mxu0 %v228_v27 }
  0x19   :  { %605 = vmatprep.subr.mxu1 %v228_v27  ;;  %573 = vmatpush3.msra.mxu0 %v228_v27 }
  0x1a   :  { %547 = vmatmul.mubr.msk.f32.gmra.mxu0 %vm34_vm0, %v23_v19  ;;  %613 = vmatpush3.msra.mxu1 %v228_v27 }
  0x1b   :  { %549 = vmatprep.mubr.msk.f32.mxu0 %vm34_vm0, %v24_v20 }
  0x1e   :  { %550 = vmatmul.mubr.msk.f32.gmra.mxu0 %vm34_vm0, %v25_v21 }
  0x1f   :  { %552 = vmatprep.mubr.msk.f32.mxu0 %vm34_vm0, %v26_v22 }
  0x22   :  { %553 = vmatmul.mubr.msk.f32.gmra.mxu0 %vm34_vm0, %v27_v23 }
  0x23   :  { %555 = vmatprep.mubr.msk.f32.mxu0 %vm34_vm0, %v28_v24 }
  0x26   :  { %556 = vmatmul.mubr.msk.f32.gmra.mxu0 %vm34_vm0, %v29_v25 }
  0xca   :  { %v536_v28 = vpop.f32.mrf.mxu0 }
  0xcc   :  { %v149_v29 = vpop.f32.mrf.mxu0 }
  0xcd   :  { %574 = vmatprep.mubr.msk.f32.mxu0 %vm236_vm1, %v149_v29 }
  0xce   :  { %v539_v30 = vpop.f32.mrf.mxu0  ;;  %575 = vmatmul.mubr.msk.f32.vlgmr.msra.gmra.mxu0 %vm236_vm1, %v536_v28 }
  0xd0   :  { %v159_v31 = vpop.f32.mrf.mxu0 }
  0xd1   :  { %577 = vmatprep.mubr.msk.f32.mxu1 %vm236_vm1, %v159_v31 }
  0xd2   :  { %v542_v32 = vpop.f32.mrf.mxu0  ;;  %578 = vmatmul.mubr.msk.f32.vlgmr.msra.gmra.mxu1 %vm236_vm1, %v539_v30 }
  0xd4   :  { %v169_v33 = vpop.f32.mrf.mxu0 }
  0xd5   :  { %580 = vmatprep.mubr.msk.f32.mxu1 %vm236_vm1, %v169_v33 }
  0xd6   :  { %v545_v34 = vpop.f32.mrf.mxu0  ;;  %581 = vmatmul.mubr.msk.f32.gmra.mxu1 %vm236_vm1, %v542_v32 }
  0xd8   :  { %v179_v35 = vpop.f32.mrf.mxu0 }
  0xd9   :  { %583 = vmatprep.mubr.msk.f32.mxu1 %vm236_vm1, %v179_v35 }
  0xda   :  { %v548_v36 = vpop.f32.mrf.mxu0  ;;  %584 = vmatmul.mubr.msk.f32.gmra.mxu1 %vm236_vm1, %v545_v34 }
  0xdc   :  { %v189_v37 = vpop.f32.mrf.mxu0 }
  0xdd   :  { %586 = vmatprep.mubr.msk.f32.mxu1 %vm236_vm1, %v189_v37 }
  0xde   :  { %v551_v38 = vpop.f32.mrf.mxu0  ;;  %587 = vmatmul.mubr.msk.f32.gmra.mxu1 %vm236_vm1, %v548_v36 }
  0xe0   :  { %v199_v39 = vpop.f32.mrf.mxu0 }
  0xe1   :  { %589 = vmatprep.mubr.msk.f32.mxu1 %vm236_vm1, %v199_v39 }
  0xe2   :  { %v554_v40 = vpop.f32.mrf.mxu0  ;;  %590 = vmatmul.mubr.msk.f32.gmra.mxu1 %vm236_vm1, %v551_v38 }
  0xe4   :  { %v209_v41 = vpop.f32.mrf.mxu0 }
  0xe5   :  { %592 = vmatprep.mubr.msk.f32.mxu1 %vm236_vm1, %v209_v41 }
  0xe6   :  { %v557_v42 = vpop.f32.mrf.mxu0  ;;  %593 = vmatmul.mubr.msk.f32.gmra.mxu1 %vm236_vm1, %v554_v40 }
  0xe8   :  { %v219_v43 = vpop.f32.mrf.mxu0 }
  0xe9   :  { %595 = vmatprep.mubr.msk.f32.mxu1 %vm236_vm1, %v219_v43 }
  0xea   :  { %596 = vmatmul.mubr.msk.f32.gmra.mxu1 %vm236_vm1, %v557_v42 }
 0x18e   :  { %v576_v44 = vpop.f32.mrf.mxu0 }
 0x18f   :  { %431 = vst [vmem:[%s801_s3 + $0x8] sm:$0xff] %v576_v44 }
 0x190   :  { %v351_v45 = vpop.f32.mrf.mxu0 }
 0x191   :  { %430 = vst [vmem:[%s801_s3] sm:$0xff] %v351_v45 }
 0x192   :  { %v579_v46 = vpop.f32.mrf.mxu1 }
 0x193   :  { %433 = vst [vmem:[%s801_s3 + $0x18] sm:$0xff] %v579_v46 }
 0x194   :  { %v361_v47 = vpop.f32.mrf.mxu1 }
 0x195   :  { %432 = vst [vmem:[%s801_s3 + $0x10] sm:$0xff] %v361_v47 }
 0x196   :  { %v582_v48 = vpop.f32.mrf.mxu1 }
 0x197   :  { %435 = vst [vmem:[%s801_s3 + $0x28] sm:$0xff] %v582_v48 }
 0x198   :  { %v371_v49 = vpop.f32.mrf.mxu1 }
 0x199   :  { %434 = vst [vmem:[%s801_s3 + $0x20] sm:$0xff] %v371_v49 }
 0x19a   :  { %v585_v50 = vpop.f32.mrf.mxu1 }
 0x19b   :  { %437 = vst [vmem:[%s801_s3 + $0x38] sm:$0xff] %v585_v50 }
 0x19c   :  { %v381_v51 = vpop.f32.mrf.mxu1 }
 0x19d   :  { %436 = vst [vmem:[%s801_s3 + $0x30] sm:$0xff] %v381_v51 }
 0x19e   :  { %v588_v52 = vpop.f32.mrf.mxu1 }
 0x19f   :  { %439 = vst [vmem:[%s801_s3 + $0x48] sm:$0xff] %v588_v52 }
 0x1a0   :  { %v391_v53 = vpop.f32.mrf.mxu1 }
 0x1a1   :  { %438 = vst [vmem:[%s801_s3 + $0x40] sm:$0xff] %v391_v53 }
 0x1a2   :  { %v591_v54 = vpop.f32.mrf.mxu1 }
 0x1a3   :  { %441 = vst [vmem:[%s801_s3 + $0x58] sm:$0xff] %v591_v54 }
 0x1a4   :  { %v401_v55 = vpop.f32.mrf.mxu1 }
 0x1a5   :  { %440 = vst [vmem:[%s801_s3 + $0x50] sm:$0xff] %v401_v55 }
 0x1a6   :  { %v594_v56 = vpop.f32.mrf.mxu1 }
 0x1a7   :  { %443 = vst [vmem:[%s801_s3 + $0x68] sm:$0xff] %v594_v56 }
 0x1a8   :  { %v411_v57 = vpop.f32.mrf.mxu1 }
 0x1a9   :  { %442 = vst [vmem:[%s801_s3 + $0x60] sm:$0xff] %v411_v57 }
 0x1aa   :  { %v597_v58 = vpop.f32.mrf.mxu1 }
 0x1ab   :  { %445 = vst [vmem:[%s801_s3 + $0x78] sm:$0xff] %v597_v58 }
 0x1ac   :  { %v421_v59 = vpop.f32.mrf.mxu1 }
 0x1ad   :  { %444 = vst [vmem:[%s801_s3 + $0x70] sm:$0xff] %v421_v59 }

</bundles_post_ra>
